<compile_context>
chip_gen: v6e
topology: v6e:2x2x1
jax: 0.10.0
libtpu: 0.0.40
codegen_flags: <defaults>
</compile_context>

<pallas_src>
import jax
import jax.numpy as jnp
from jax.experimental import pallas as pl
from jax.experimental.pallas import tpu as pltpu


_MIN_BLOCK_BYTES = 2 * 1024 * 1024      # keep per-step DMA blocks >= ~2 MiB when possible
_MIN_GRID_STEPS = 8                     # >= 8 steps: pipeline depth + both v7x TCs busy
_CHUNK_TARGET_BYTES = 768 * 1024        # cap on per-chunk f32 temporaries in the fused kernel
_SMALL_SINGLE_BLOCK = 4 * 1024 * 1024   # B == 1 below this: a single fused step is fine


# --------------------------------------------------------------------------
# Generation-aware VMEM sizing (v5e/v6e: 128 MiB, v7x: 64 MiB per TensorCore).
# --------------------------------------------------------------------------
def _vmem_capacity_bytes():
    try:
        cap = int(pltpu.get_tpu_info().vmem_capacity_bytes)
        if cap > 0:
            return cap
    except Exception:
        pass
    return 64 * 1024 * 1024             # v7x-sized fallback: safe on every generation


def _derive_budgets():
    """Return (x-block budget, scoped-VMEM limit) from the chip's VMEM capacity.

    Path A holds a double-buffered x block plus a double-buffered out block
    (~4x the block size), so budget ~= limit/4 with headroom for the in-kernel
    f32 chunk temporaries and Mosaic internal scratch.
    v5e/v6e (128 MiB): limit ~96 MiB, budget ~22 MiB.  v7x (64 MiB): ~48 / ~10 MiB.
    """
    cap = _vmem_capacity_bytes()
    vmem_limit = max(32 << 20, min(int(cap * 0.75), cap - (12 << 20)))
    x_budget = max(2 << 20, vmem_limit // 4 - (2 << 20))
    return x_budget, vmem_limit


# --------------------------------------------------------------------------
# Tiling heuristics.
# --------------------------------------------------------------------------
def _pick_tb(b, per_batch_bytes, budget):
    """Batch fold for Path A: prefer >= 2 steps (both v7x TCs), then pipeline
    depth up to _MIN_GRID_STEPS, then blocks >= _MIN_BLOCK_BYTES, then size."""
    fitting = [d for d in range(1, b + 1)
               if b % d == 0 and d * per_batch_bytes <= budget]
    if not fitting:
        return None

    def score(d):
        steps = b // d
        block = d * per_batch_bytes
        return (steps >= 2, min(steps, _MIN_GRID_STEPS),
                block >= _MIN_BLOCK_BYTES, block)

    return max(fitting, key=score)


def _pick_chunk(tb, c, hw):
    """Lane chunk for the fused kernel's two streaming passes: 128-multiple,
    sized so the (tb, c, chunk) f32 temporary stays ~<= _CHUNK_TARGET_BYTES."""
    lanes = _CHUNK_TARGET_BYTES // max(1, tb * c * 4)
    lanes = max(128, (lanes // 128) * 128)
    hw_ceil = -(-hw // 128) * 128
    return int(min(lanes, hw_ceil))


def _pick_thw(c, hw, itemsize, budget, batch):
    """Lane tile for Path B: 128-multiple, within the block budget, sized so the
    total grid (batch * hw-tiles) has >= _MIN_GRID_STEPS steps."""
    budget_lanes = max(128, (budget // max(1, c * itemsize)) // 128 * 128)
    want_hw_tiles = max(1, -(-_MIN_GRID_STEPS // max(1, batch)))
    per_tile = -(-hw // want_hw_tiles)
    target_lanes = max(128, -(-per_tile // 128) * 128)
    hw_ceil = -(-hw // 128) * 128
    return int(max(128, min(budget_lanes, target_lanes, hw_ceil)))


# --------------------------------------------------------------------------
# Path A: fused single-pass kernel (whole HW per block, TB batches folded).
# --------------------------------------------------------------------------
def _make_fused_kernel(tb, c, hw, chunk):
    n_full = hw // chunk
    rem = hw - n_full * chunk
    inv_hw = 1.0 / hw
    unroll = bool(n_full <= 8)

    def kernel(x_ref, w1_ref, w2_ref, o_ref):
        # ---- Pass 1: chunked per-channel sum & max over HW (f32 accumulation).
        def reduce_chunk(carry, start, size):
            s, m = carry
            blk = x_ref[:, :, pl.ds(start, size)].astype(jnp.float32)
            return (s + jnp.sum(blk, axis=-1),
                    jnp.maximum(m, jnp.max(blk, axis=-1)))

        carry = (jnp.zeros((tb, c), jnp.float32),
                 jnp.full((tb, c), -jnp.inf, jnp.float32))
        if n_full:
            def body(i, carry):
                return reduce_chunk(carry, pl.multiple_of(i * chunk, 128), chunk)
            carry = jax.lax.fori_loop(0, n_full, body, carry, unroll=unroll)
        if rem:
            carry = reduce_chunk(carry, n_full * chunk, rem)
        s, m = carry
        avg = s * inv_hw                                            # (tb, c)

        # ---- Squeeze-excite MLP fused over [avg; max] -> 2 matmuls total.
        pooled = jnp.concatenate([avg, m], axis=0)                  # (2*tb, c)
        w1 = w1_ref[...].astype(jnp.float32)                        # (cr, c)
        w2 = w2_ref[...].astype(jnp.float32)                        # (c, cr)
        hmid = jnp.maximum(
            jax.lax.dot_general(pooled, w1, (((1,), (1,)), ((), ())),
                                preferred_element_type=jnp.float32), 0.0)
        logits2 = jax.lax.dot_general(hmid, w2, (((1,), (1,)), ((), ())),
                                      preferred_element_type=jnp.float32)
        attn = jax.nn.sigmoid(logits2[:tb] + logits2[tb:])          # (tb, c) f32
        # Hoisted, native-dtype attention factor (no f32 round-trip in pass 2).
        attn3 = attn.astype(o_ref.dtype)[:, :, None]                # (tb, c, 1)

        # ---- Pass 2: streaming broadcast-multiply + store in the input dtype.
        def store_chunk(start, size):
            o_ref[:, :, pl.ds(start, size)] = (
                x_ref[:, :, pl.ds(start, size)] * attn3)

        if n_full:
            def store_body(i, _):
                store_chunk(pl.multiple_of(i * chunk, 128), chunk)
                return 0
            jax.lax.fori_loop(0, n_full, store_body, 0, unroll=unroll)
        if rem:
            store_chunk(n_full * chunk, rem)

    return kernel


def _fused_channel_attention(x_flat, w1, w2, budget, vmem_limit):
    b, c, hw = x_flat.shape
    cr = w1.shape[0]
    per_batch = c * hw * jnp.dtype(x_flat.dtype).itemsize
    tb = _pick_tb(b, per_batch, budget)
    chunk = _pick_chunk(tb, c, hw)

    return pl.pallas_call(
        _make_fused_kernel(tb, c, hw, chunk),
        out_shape=jax.ShapeDtypeStruct((b, c, hw), x_flat.dtype),
        grid_spec=pltpu.PrefetchScalarGridSpec(
            num_scalar_prefetch=0,
            grid=(b // tb,),
            in_specs=[
                pl.BlockSpec((tb, c, hw), lambda i: (i, 0, 0)),
                pl.BlockSpec((cr, c), lambda i: (0, 0)),
                pl.BlockSpec((c, cr), lambda i: (0, 0)),
            ],
            out_specs=pl.BlockSpec((tb, c, hw), lambda i: (i, 0, 0)),
        ),
        compiler_params=pltpu.CompilerParams(
            dimension_semantics=("parallel",),
            vmem_limit_bytes=vmem_limit,
        ),
    )(x_flat, w1, w2)


# --------------------------------------------------------------------------
# Path B: HW-tiled two-pass (strip-accumulated reduce -> attn, then apply).
# --------------------------------------------------------------------------
def _make_reduce_kernel(c, hw, thw):
    inv_hw = 1.0 / hw
    n_hw = -(-hw // thw)
    last = n_hw - 1
    rem = hw - last * thw            # valid lanes in the last tile (== thw if exact)

    def accum_tile(x_ref, sum_acc, max_acc, limit):
        """Fold one (c, limit) tile into (c, 128) strip accumulators: VALU-only
        adds/maxes; the single cross-lane XLU fold is deferred to finalize."""
        nfull = limit // 128
        tail = limit - nfull * 128

        def body(k, carry):
            s, m = carry
            start = pl.multiple_of(k * 128, 128)
            blk = x_ref[0, :, pl.ds(start, 128)].astype(jnp.float32)
            return s + blk, jnp.maximum(m, blk)

        carry = (jnp.zeros((c, 128), jnp.float32),
                 jnp.full((c, 128), -jnp.inf, jnp.float32))
        if nfull:
            carry = jax.lax.fori_loop(0, nfull, body, carry, unroll=(nfull <= 8))
        s, m = carry
        if tail:
            start = nfull * 128
            blk = x_ref[0, :, pl.ds(start, 128)].astype(jnp.float32)
            lane = jax.lax.broadcasted_iota(jnp.int32, (c, 128), 1)
            valid = lane < tail
            s = s + jnp.where(valid, blk, 0.0)
            m = jnp.maximum(m, jnp.where(valid, blk, -jnp.inf))
        sum_acc[...] += s
        max_acc[...] = jnp.maximum(max_acc[...], m)

    def kernel(x_ref, w1_ref, w2_ref, attn_ref, sum_acc, max_acc):
        h_idx = pl.program_id(1)

        @pl.when(h_idx == 0)
        def _():
            sum_acc[...] = jnp.zeros_like(sum_acc)
            max_acc[...] = jnp.full_like(max_acc, -jnp.inf)

        if rem == thw:
            # HW divides evenly: every tile is full, no masking anywhere.
            accum_tile(x_ref, sum_acc, max_acc, thw)
        else:
            # Only the last (partial) tile pays for masking.
            @pl.when(h_idx < last)
            def _():
                accum_tile(x_ref, sum_acc, max_acc, thw)

            @pl.when(h_idx == last)
            def _():
                accum_tile(x_ref, sum_acc, max_acc, rem)

        @pl.when(h_idx == last)
        def _():
            # One cross-lane fold per batch, then the tiny SE MLP.
            s = jnp.sum(sum_acc[...], axis=-1, keepdims=True) * inv_hw     # (c, 1)
            m = jnp.max(max_acc[...], axis=-1, keepdims=True)              # (c, 1)
            pooled = jnp.concatenate([s, m], axis=1)                       # (c, 2)
            w1 = w1_ref[...].astype(jnp.float32)                           # (cr, c)
            w2 = w2_ref[...].astype(jnp.float32)                           # (c, cr)
            hmid = jnp.maximum(
                jnp.dot(w1, pooled, preferred_element_type=jnp.float32), 0.0)
            logits2 = jnp.dot(w2, hmid, preferred_element_type=jnp.float32)
            attn = jax.nn.sigmoid(logits2[:, :1] + logits2[:, 1:2])        # (c, 1)
            attn_ref[0] = attn.astype(attn_ref.dtype)

    return kernel


def _apply_kernel(x_ref, attn_ref, o_ref):
    # Pure streaming broadcast-multiply in the native dtype (no f32 round-trip).
    o_ref[...] = x_ref[...] * attn_ref[...].astype(o_ref.dtype)


def _two_pass_channel_attention(x_flat, w1, w2, budget, vmem_limit):
    b, c, hw = x_flat.shape
    cr = w1.shape[0]
    itemsize = jnp.dtype(x_flat.dtype).itemsize
    thw = _pick_thw(c, hw, itemsize, budget, b)
    n_hw = -(-hw // thw)

    attn = pl.pallas_call(
        _make_reduce_kernel(c, hw, thw),
        out_shape=jax.ShapeDtypeStruct((b, c, 1), jnp.float32),
        grid_spec=pltpu.PrefetchScalarGridSpec(
            num_scalar_prefetch=0,
            grid=(b, n_hw),
            in_specs=[
                pl.BlockSpec((1, c, thw), lambda i, j: (i, 0, j)),
                pl.BlockSpec((cr, c), lambda i, j: (0, 0)),
                pl.BlockSpec((c, cr), lambda i, j: (0, 0)),
            ],
            out_specs=pl.BlockSpec((1, c, 1), lambda i, j: (i, 0, 0)),
            scratch_shapes=[pltpu.VMEM((c, 128), jnp.float32),
                            pltpu.VMEM((c, 128), jnp.float32)],
        ),
        compiler_params=pltpu.CompilerParams(
            dimension_semantics=("parallel", "arbitrary"),
            vmem_limit_bytes=vmem_limit,
        ),
    )(x_flat, w1, w2)

    return pl.pallas_call(
        _apply_kernel,
        out_shape=jax.ShapeDtypeStruct((b, c, hw), x_flat.dtype),
        grid_spec=pltpu.PrefetchScalarGridSpec(
            num_scalar_prefetch=0,
            grid=(b, n_hw),
            in_specs=[
                pl.BlockSpec((1, c, thw), lambda i, j: (i, 0, j)),
                pl.BlockSpec((1, c, 1), lambda i, j: (i, 0, 0)),
            ],
            out_specs=pl.BlockSpec((1, c, thw), lambda i, j: (i, 0, j)),
        ),
        compiler_params=pltpu.CompilerParams(
            dimension_semantics=("parallel", "parallel"),
            vmem_limit_bytes=vmem_limit,
        ),
    )(x_flat, attn)


# --------------------------------------------------------------------------
# Public wrapper
# --------------------------------------------------------------------------
def channel_attention(x, w1, w2, *, x_block_budget_bytes=None, vmem_limit_bytes=None):
    """x: (B, C, H, W). w1: (C//r, C). w2: (C, C//r).
    Returns sigmoid(fc(avg_pool(x)) + fc(max_pool(x))) * x (PyTorch module semantics)."""
    b, c, h, w = x.shape
    hw = h * w
    auto_budget, auto_limit = _derive_budgets()
    budget = x_block_budget_bytes if x_block_budget_bytes is not None else auto_budget
    vmem_limit = vmem_limit_bytes if vmem_limit_bytes is not None else auto_limit

    # TODO(synk): optionally pad HW to a multiple of 128 in the wrapper to avoid
    # masked remainder stores for odd CNN map sizes (e.g. 7x7, 14x14).
    x_flat = x.reshape(b, c, hw)
    per_batch = c * hw * jnp.dtype(x.dtype).itemsize
    # Path A (single HBM read of x) whenever the per-batch slab fits the block
    # budget and the batch axis can supply >= 2 grid steps; B == 1 feature maps
    # big enough to matter go to the HW-tiled path so the DMA pipeline (and the
    # second v7x TensorCore) still gets work.
    use_fused = per_batch <= budget and (b >= 2 or per_batch <= _SMALL_SINGLE_BLOCK)
    if use_fused:
        out_flat = _fused_channel_attention(x_flat, w1, w2, budget, vmem_limit)
    else:
        out_flat = _two_pass_channel_attention(x_flat, w1, w2, budget, vmem_limit)
    return out_flat.reshape(b, c, h, w)


def _reference(x, w1, w2):
    # Pure-JAX reference matching the PyTorch module semantics.
    avg = jnp.mean(x, axis=(2, 3))                       # (B, C)
    mx = jnp.max(x, axis=(2, 3))                         # (B, C)

    def fc(v):  # v: (B, C)
        h = jnp.maximum(v @ w1.T, 0.0)                   # (B, C//r)
        return h @ w2.T                                  # (B, C)

    attn = jax.nn.sigmoid(fc(avg) + fc(mx))              # (B, C)
    return attn[:, :, None, None] * x


if __name__ == "__main__":
    key = jax.random.PRNGKey(0)
    kx, k1, k2, kx2 = jax.random.split(key, 4)

    # Module config: in_channels=32, reduction_ratio=16 -> hidden width 2.
    B, C, H, W = 2, 32, 16, 16
    Cr = C // 16
    x = jax.random.normal(kx, (B, C, H, W), dtype=jnp.float32)
    # Deterministic weights (kaiming-like scale), bias=False as in the module.
    w1 = jax.random.normal(k1, (Cr, C), dtype=jnp.float32) * (2.0 / C) ** 0.5
    w2 = jax.random.normal(k2, (C, Cr), dtype=jnp.float32) * (2.0 / Cr) ** 0.5

    # Path A: fused single-read kernel (feature map fits the VMEM block budget).
    out = jax.block_until_ready(channel_attention(x, w1, w2))
    ref = _reference(x, w1, w2)
    assert out.shape == (B, C, H, W)
    assert jnp.allclose(out, ref, atol=1e-4, rtol=1e-4), "fused path mismatch"

    # Path B: HW-tiled two-pass, forced via a tiny block budget (the
    # shape-robust route for feature maps bigger than one VMEM block).
    # 24*24 = 576 lanes -> full 256-lane tiles plus a masked 64-lane tail.
    H2 = W2 = 24
    x2 = jax.random.normal(kx2, (B, C, H2, W2), dtype=jnp.float32)
    out2 = jax.block_until_ready(
        channel_attention(x2, w1, w2, x_block_budget_bytes=C * 256 * 4))
    ref2 = _reference(x2, w1, w2)
    assert out2.shape == (B, C, H2, W2)
    assert jnp.allclose(out2, ref2, atol=1e-4, rtol=1e-4), "two-pass path mismatch"

    print("KERNEL_OK")
</pallas_src>

<mosaic_0001>
module attributes {stable_mosaic.version = 11 : i64} {
  func.func @kernel(%arg0: i32, %arg1: memref<1x32x256xf32, #tpu.memory_space<vmem>>, %arg2: memref<2x32xf32, #tpu.memory_space<vmem>>, %arg3: memref<32x2xf32, #tpu.memory_space<vmem>>, %arg4: memref<1x32x256xf32, #tpu.memory_space<vmem>>) attributes {dimension_semantics = [#tpu.dimension_semantics<parallel>], iteration_bounds = array<i64: 2>, scalar_prefetch = 0 : i64, scratch_operands = 0 : i64, tpu.core_type = #tpu.core_type<tc>, window_params = [{transform_indices = @transform_0, window_bounds = array<i64: 1, 32, 256>}, {pipeline_mode = #tpu.pipeline_mode<synchronous>, transform_indices = @transform_1, window_bounds = array<i64: 2, 32>}, {pipeline_mode = #tpu.pipeline_mode<synchronous>, transform_indices = @transform_2, window_bounds = array<i64: 32, 2>}, {transform_indices = @transform_3, window_bounds = array<i64: 1, 32, 256>}]} {
    %cst = arith.constant 0.000000e+00 : f32
    %0 = vector.broadcast %cst : f32 to vector<1x32xf32>
    %cst_0 = arith.constant 0xFF800000 : f32
    %1 = vector.broadcast %cst_0 : f32 to vector<1x32xf32>
    %c0_i32 = arith.constant 0 : i32
    %c256_i32 = arith.constant 256 : i32
    %2 = arith.muli %c0_i32, %c256_i32 : i32
    %3 = tpu.assume_multiple %2, 128 : i32
    %c0 = arith.constant 0 : index
    %c0_1 = arith.constant 0 : index
    %4 = arith.index_cast %3 : i32 to index
    %5 = vector.load %arg1[%c0, %c0_1, %4] : memref<1x32x256xf32, #tpu.memory_space<vmem>>, vector<1x32x256xf32>
    %cst_2 = arith.constant dense<0.000000e+00> : vector<1x32xf32>
    %6 = vector.multi_reduction <add>, %5, %cst_2 [2] : vector<1x32x256xf32> to vector<1x32xf32>
    %7 = arith.addf %0, %6 : vector<1x32xf32>
    %cst_3 = arith.constant dense<0xFF800000> : vector<1x32xf32>
    %8 = vector.multi_reduction <maximumf>, %5, %cst_3 [2] : vector<1x32x256xf32> to vector<1x32xf32>
    %9 = arith.maximumf %1, %8 : vector<1x32xf32>
    %c1_i32 = arith.constant 1 : i32
    %cst_4 = arith.constant 3.906250e-03 : f32
    %10 = vector.broadcast %cst_4 : f32 to vector<1x32xf32>
    %11 = arith.mulf %7, %10 : vector<1x32xf32>
    %12 = tpu.concatenate %11, %9 in 0 : vector<1x32xf32>, vector<1x32xf32> -> vector<2x32xf32>
    %c0_5 = arith.constant 0 : index
    %c0_6 = arith.constant 0 : index
    %13 = vector.load %arg2[%c0_5, %c0_6] : memref<2x32xf32, #tpu.memory_space<vmem>>, vector<2x32xf32>
    %c0_7 = arith.constant 0 : index
    %c0_8 = arith.constant 0 : index
    %14 = vector.load %arg3[%c0_7, %c0_8] : memref<32x2xf32, #tpu.memory_space<vmem>>, vector<32x2xf32>
    %cst_9 = arith.constant dense<0.000000e+00> : vector<2x2xf32>
    %15 = tpu.matmul %12, %13, %cst_9 {dimension_numbers = #tpu.dot_dimension_numbers<[1], [1], [0], [0], [0, 0, 1, 0], [], []>} : vector<2x32xf32>, vector<2x32xf32>, vector<2x2xf32> -> vector<2x2xf32>
    %cst_10 = arith.constant 0.000000e+00 : f32
    %16 = vector.broadcast %cst_10 : f32 to vector<2x2xf32>
    %17 = arith.maximumf %15, %16 : vector<2x2xf32>
    %cst_11 = arith.constant dense<0.000000e+00> : vector<2x32xf32>
    %18 = tpu.matmul %17, %14, %cst_11 {dimension_numbers = #tpu.dot_dimension_numbers<[1], [1], [0], [0], [0, 0, 1, 0], [], []>} : vector<2x2xf32>, vector<32x2xf32>, vector<2x32xf32> -> vector<2x32xf32>
    %19 = vector.extract_strided_slice %18 {offsets = [0, 0], sizes = [1, 32], strides = [1, 1]} : vector<2x32xf32> to vector<1x32xf32>
    %20 = vector.extract_strided_slice %18 {offsets = [1, 0], sizes = [1, 32], strides = [1, 1]} : vector<2x32xf32> to vector<1x32xf32>
    %21 = arith.addf %19, %20 : vector<1x32xf32>
    %22 = arith.negf %21 : vector<1x32xf32>
    %23 = math.exp %22 : vector<1x32xf32>
    %cst_12 = arith.constant 1.000000e+00 : f32
    %24 = vector.broadcast %cst_12 : f32 to vector<1x32xf32>
    %25 = arith.addf %24, %23 : vector<1x32xf32>
    %26 = arith.divf %24, %25 : vector<1x32xf32>
    %27 = vector.shape_cast %26 : vector<1x32xf32> to vector<1x32x1xf32>
    %c0_i32_13 = arith.constant 0 : i32
    %c256_i32_14 = arith.constant 256 : i32
    %28 = arith.muli %c0_i32_13, %c256_i32_14 : i32
    %29 = tpu.assume_multiple %28, 128 : i32
    %c0_15 = arith.constant 0 : index
    %c0_16 = arith.constant 0 : index
    %30 = arith.index_cast %29 : i32 to index
    %31 = vector.load %arg1[%c0_15, %c0_16, %30] : memref<1x32x256xf32, #tpu.memory_space<vmem>>, vector<1x32x256xf32>
    %32 = vector.broadcast %27 : vector<1x32x1xf32> to vector<1x32x256xf32>
    %33 = arith.mulf %31, %32 : vector<1x32x256xf32>
    %c0_17 = arith.constant 0 : index
    %c0_18 = arith.constant 0 : index
    %34 = arith.index_cast %29 : i32 to index
    %35 = vector.load %arg4[%c0_17, %c0_18, %34] : memref<1x32x256xf32, #tpu.memory_space<vmem>>, vector<1x32x256xf32>
    tpu.vector_store %arg4[%c0_17, %c0_18, %34], %33 {strides = array<i32>} : memref<1x32x256xf32, #tpu.memory_space<vmem>>, vector<1x32x256xf32>,
    %c1_i32_19 = arith.constant 1 : i32
    return
  }
  func.func @transform_0(%arg0: i32) -> (i32, i32, i32) {
    %c0_i32 = arith.constant 0 : i32
    %c0_i32_0 = arith.constant 0 : i32
    %c0_i32_1 = arith.constant 0 : i32
    return %arg0, %c0_i32, %c0_i32_0 : i32, i32, i32
  }
  func.func @transform_1(%arg0: i32) -> (i32, i32) {
    %c0_i32 = arith.constant 0 : i32
    %c0_i32_0 = arith.constant 0 : i32
    %c0_i32_1 = arith.constant 0 : i32
    return %c0_i32, %c0_i32_0 : i32, i32
  }
  func.func @transform_2(%arg0: i32) -> (i32, i32) {
    %c0_i32 = arith.constant 0 : i32
    %c0_i32_0 = arith.constant 0 : i32
    %c0_i32_1 = arith.constant 0 : i32
    return %c0_i32, %c0_i32_0 : i32, i32
  }
  func.func @transform_3(%arg0: i32) -> (i32, i32, i32) {
    %c0_i32 = arith.constant 0 : i32
    %c0_i32_0 = arith.constant 0 : i32
    %c0_i32_1 = arith.constant 0 : i32
    return %arg0, %c0_i32, %c0_i32_0 : i32, i32, i32
  }
}

</mosaic_0001>

<bundles_post_ra>
// kernel: tpu_custom_call.1
= control target key start
LH: loop header
LB: loop body
LE: loop exit
PB: predicated region body
PF: predicated region fallthrough
CT: control target
= control target key end

     0   :  { %8 = vsyncpa [#allocation3], 0  ;;  %s1035_s0 = inlined_call_operand.hbm [shape: f32[2,32,256], index: 0, kind: input, shape index: {}]   ;;  %s1036_s1 = inlined_call_operand.vmem [shape: f32[2,32], index: 1, kind: input, shape index: {}]   ;;  %s1037_s2 = inlined_call_operand.vmem [shape: f32[32,2], index: 2, kind: input, shape index: {}]   ;;  %s1038_s3 = inlined_call_operand.hbm [shape: f32[2,32,256], index: 3, kind: output, shape index: {}]  }
   0x1   :  { %10 = vsyncpa [#allocation3 + $0x1], 0 }
   0x2   :  { %11 = vsyncpa [#allocation4], 0 }
   0x3   :  { %13 = vsyncpa [#allocation4 + $0x1], 0  ;;  %s813_s12 = smov 0   ;;  %s815_s13 = smov 0  }
   0x4   :  { %s817_s14 = smov 0   ;;  %s819_s15 = smov 0  }
   0x5 LB: > { %s834_s16 = sadd.s32 4294967295, %s783_s15   ;;  %s588_s17 = sadd.s32 4294967294, %s783_s15   ;;  %s783_s15 = sphi %s819_s15, %s1053_s15   ;;  %s779_s14 = sphi %s817_s14, %s1052_s14   ;;  %s775_s13 = sphi %s815_s13, %s1051_s13   ;;  %s771_s12 = sphi %s813_s12, %s1050_s12  }
   0x6   : > { %s838_s18 = sadd.s32 1, %s783_s15   ;;  %s26_s19 = sadd.s32 1, %s779_s14 }
   0x7   : > { %s23_s20 = ssub.s32 %s783_s15, %s838_s18  ;;  %p33_p0 = scmp.ne.s32.totalorder %s779_s14, %s775_s13 }
   0x8   : > { %p24_p1 = scmp.eq.s32.totalorder %s23_s20, 0  ;;  %p34_p2 = scmp.eq.s32.totalorder %s783_s15, 0 }
   0x9   : > { %p39_p3 = scmp.ne.s32.totalorder %s775_s13, %s771_s12  ;;  %p40_p4 = scmp.eq.s32.totalorder %s834_s16, 0 }
   0xa   : > { %s850_s21 = scalar_select %p24_p1, %s779_s14, %s26_s19  }
   0xb   : > { %p852_p5 = por %p34_p2, %p33_p0  ;;  %p856_p6 = por %p40_p4, %p39_p3 }
   0xc   : > { %p105_p7 = scmp.eq.s32.totalorder %s834_s16, 1  ;;  %p111_p8 = scmp.eq.s32.totalorder %s588_s17, 1 }
   0xd   : > { %s1042_s23 = scalar_select %p856_p6, 1, 0 }
   0xe   : > { %p647_p10 = scmp.lt.s32.totalorder %s783_s15, 2  ;;  %p863_p11 = por %p105_p7, %p33_p0 }
   0xf   : > { %p867_p12 = por %p111_p8, %p39_p3  ;;  %s137_s26 = sand.u32 1, %s779_s14  }
  0x10   : > { %s1043_s24 = scalar_select %p863_p11, 1, 0 }
  0x11   : > { %s1044_s25 = scalar_select %p867_p12, 1, 0 }
  0x12   : > { %s610_s27 = sshll.u32 %s783_s15, 10  ;;  %s591_s28 = sshll.u32 %s137_s26, 6 }
  0x13   : > { %s876_s4 = scalar_lea.hbm %s1035_s0, %s610_s27  ;;  %s141_s5 = scalar_lea.vmem [#allocation2], %s591_s28 }
  0x14   : > { %s148_s6 = sshll.u32 %s141_s5, 4  ;;  %p880_p13 = pnand %p647_p10, %p852_p5  ;;  %s884_s6 = int_to_ptr.vmem [resolvable:$true] %s148_s6 }
  0x15   : > { %s886_s8 = scalar_lea.sflag [#allocation3], %s137_s26  ;;  %s691_s9 = scalar_lea.hbm %s876_s4, 1024 }
  0x16   : > { %p692_p0 = scmp.ne.s32.totalorder %s876_s4, %s691_s9  ;;  %p693_p1 = pneg %p880_p13 }
  0x17   : > { %s696_s17 = scalar_lea.hbm %s1035_s0, 2048  ;;  %p697_p4 = scmp.lt.s32.totalorder %s876_s4, %s1035_s0 }
  0x18   : > { %p694_p2 = pnand %p693_p1, %p692_p0  ;;  %p698_p5 = scmp.lt.s32.totalorder %s696_s17, %s691_s9 }
  0x1a   : > { %p695_p3 = pneg %p694_p2  ;;  %p699_p7 = por %p698_p5, %p697_p4 }
  0x1c   : > { %p700_p8 = pnand %p699_p7, %p695_p3 }
  0x1e   : > { %703 = shalt.err (!%p700_p8)
}
  0x1f   : > { %s704_s22 = scalar_lea.vmem %s884_s6, 1024  ;;  %s785_s26 = smov [#allocation2]  }
  0x20   : > { %p705_p10 = scmp.ne.s32.totalorder %s884_s6, %s704_s22  ;;  %s709_s27 = sshll.u32 %s785_s26, 4  ;;  %s710_s27 = int_to_ptr.vmem [resolvable:$false] %s709_s27 }
  0x21   : > { %s711_s28 = scalar_lea.vmem %s710_s27, 2048  ;;  %p712_p2 = scmp.lt.s32.totalorder %s884_s6, %s710_s27 }
  0x22   : > { %p707_p9 = pnand %p705_p10, %p693_p1  ;;  %p713_p12 = scmp.lt.s32.totalorder %s711_s28, %s704_s22 }
  0x24   : > { %p708_p0 = pneg %p707_p9  ;;  %p714_p11 = por %p713_p12, %p712_p2 }
  0x26   : > { %p715_p6 = pnand %p714_p11, %p708_p0 }
  0x28   : > { %718 = shalt.err (!%p715_p6)
}
  0x29   : > { %s786_s29 = smov 256   ;;  %s787_s30 = smov 16  }
  0x2a   : > { %642 = dma.hbm_to_vmem [thread:$0]  (!%p880_p13), %s876_s4, 1024, %s884_s6, %s886_s8, %s786_s29, %s786_s29, %s787_s30  }
  0x2b   : > { %p594_p9 = scmp.ge.s32.totalorder %s783_s15, 1  ;;  %p156_p1 = scmp.lt.s32.totalorder %s783_s15, 3 }
  0x2d   : > { %p157_p3 = pnand %p594_p9, %p156_p1 }
  0x2e   : > { %s910_s5 = sand.u32 (!%p157_p3), 1, %s775_s13   ;;  %p1046_p6 = scmp.ne.s32.totalorder (!%p157_p3), %s1042_s23, 0 }
  0x2f   : > { %160 = sbr.rel (%p157_p3) target bundleno = 777 (0x309), region = 32  ;;  %s595_s9 = sshll.u32 (!%p157_p3), %s910_s5, 6 }
  0x30   : > { %s163_s10 = scalar_lea.sflag (!%p157_p3), [#allocation3], %s910_s5  ;;  %s166_s11 = scalar_lea.vmem (!%p157_p3), [#allocation2], %s595_s9 }
  0x34   : > { %762 = dma.done.wait (%p1046_p6), %s163_s10, 1024  }
  0x35   : > { %764 = vsyncadd (%p1046_p6), %s163_s10, 4294966272  ;;  %v920_v0 = vld [vmem:[%s166_s11 + $0x20] sm:$0xff]  ;;  %v922_v1 = vld [vmem:[%s166_s11 + $0x28] sm:$0xff]  ;;  %v788_v16 = vmov 0.0   ;;  %vm292_vm0 = vcmask 261120   ;;  %vm789_vm1 = vmmov 0   ;;  %v233_v21 = vlaneseq }
  0x36   : > { %v924_v2 = vld [vmem:[%s166_s11] sm:$0xff]  ;;  %v203_v3 = vadd.f32 %v922_v1, %v920_v0  ;;  %v928_v4 = vld [vmem:[%s166_s11 + $0x8] sm:$0xff]  ;;  %v930_v5 = vld [vmem:[%s166_s11 + $0x30] sm:$0xff]  ;;  %v219_v15 = vmax.f32 %v920_v0, %v922_v1  ;;  %619 = vmatprep.subr.mxu0 %v788_v16  ;;  %624 = vmatprep.subr.mxu1 %v788_v16  ;;  %vm370_vm2 = vcmask 15360   ;;  %vm244_vm3 = vcmask 130112   ;;  %s188_s27 = scalar_lea.vmem [#allocation5], %s595_s9 }
  0x37   : > { %v932_v6 = vld [vmem:[%s166_s11 + $0x38] sm:$0xff]  ;;  %v197_v7 = vadd.f32 %v928_v4, %v924_v2  ;;  %v936_v8 = vld [vmem:[%s166_s11 + $0x10] sm:$0xff]  ;;  %v213_v13 = vmax.f32 %v924_v2, %v928_v4  ;;  %v287_v17 = vld [vmem:[%s1036_s1] sm:$0x3]  ;;  %621 = vmatprep.mubr.msk.f32.mxu0 %vm789_vm1, %v788_v16  ;;  %632 = vmatprep.mubr.msk.f32.mxu1 %vm789_vm1, %v788_v16  ;;  %v234_v22 = vand.u32 127, %v233_v21  ;;  %v236_v25 = vshrl.u32 %v233_v21, 7 }
  0x38   : > { %v938_v9 = vld [vmem:[%s166_s11 + $0x18] sm:$0xff]  ;;  %204 = vadd.xlane.f32.xlu1 %v203_v3  ;;  %v206_v10 = vadd.f32 %v932_v6, %v930_v5  ;;  %v222_v14 = vmax.f32 %v930_v5, %v932_v6  ;;  %620 = vmatpush3.xpose.msk.msra.mxu0 %vm292_vm0, %v287_v17  ;;  %v290_v19 = vld [vmem:[%s1037_s2 + $0x10] sm:$0xff]  ;;  %v289_v20 = vld [vmem:[%s1037_s2 + $0x8] sm:$0xff]  ;;  %vm251_vm4 = vcmask 195712   ;;  %vm258_vm5 = vcmask 261312   ;;  %s515_s28 = sshll.u32 %s188_s27, 4  ;;  %s985_s28 = int_to_ptr.vmem [resolvable:$true] %s515_s28 }
  0x39   : > { %198 = vadd.xlane.f32.xlu0 %v197_v7  ;;  %v200_v11 = vadd.f32 %v938_v9, %v936_v8  ;;  %v216_v12 = vmax.f32 %v936_v8, %v938_v9  ;;  %v291_v18 = vld [vmem:[%s1037_s2 + $0x18] sm:$0xff]  ;;  %v239_v24 = vadd.s32 4294967288, %v234_v22  ;;  %v246_v27 = vadd.s32 4294967280, %v234_v22  ;;  %v288_v58 = vld [vmem:[%s1037_s2] sm:$0xff]  ;;  %s611_s29 = sshll.u32 %s834_s16, 10  ;;  %s502_s16 = scalar_lea.sflag [#allocation4], %s910_s5 }
  0x3a   : > { %625 = vmatpush3.xpose.msk.msra.mxu1 %vm370_vm2, %v291_v18  ;;  %v237_v30 = vsub.s32 %v234_v22, %v236_v25  ;;  %v253_v32 = vadd.s32 4294967272, %v234_v22  ;;  %vm285_vm6 = vcmask 1040384   ;;  %s990_s10 = scalar_lea.hbm %s1038_s3, %s611_s29  ;;  %s719_s11 = scalar_lea.vmem %s985_s28, 1024 }
  0x3b   : > { %626 = vmatprep.subr.mxu1 %v788_v16  ;;  %v242_v29 = vsub.s32 %v239_v24, %v236_v25  ;;  %v249_v35 = vsub.s32 %v246_v27, %v236_v25  ;;  %p720_p11 = scmp.ne.s32.totalorder %s985_s28, %s719_s11  ;;  %p1047_p12 = scmp.ne.s32.totalorder %s1043_s24, 0 }
  0x3c   : > { %207 = vadd.xlane.f32.xlu1 %v206_v10  ;;  %v256_v40 = vsub.s32 %v253_v32, %v236_v25  ;;  %s790_s23 = smov [#allocation5]  }
  0x3d   : > { %201 = vadd.xlane.f32.xlu0 %v200_v11  ;;  %p721_p13 = pnand %p720_p11, %p1047_p12  ;;  %s723_s4 = sshll.u32 %s790_s23, 4  ;;  %s724_s4 = int_to_ptr.vmem [resolvable:$false] %s723_s4 }
  0x3e   : > { %627 = vmatpush3.xpose.msk.msra.mxu1 %vm370_vm2, %v290_v19  ;;  %s725_s6 = scalar_lea.vmem %s724_s4, 2048  ;;  %p726_p5 = scmp.lt.s32.totalorder %s985_s28, %s724_s4 }
  0x3f   : > { %628 = vmatprep.subr.mxu1 %v788_v16  ;;  %p722_p4 = pneg %p721_p13  ;;  %p727_p7 = scmp.lt.s32.totalorder %s725_s6, %s719_s11 }
  0x40   : > { %217 = vmax.xlane.f32.xlu1 %v216_v12 }
  0x41   : > { %214 = vmax.xlane.f32.xlu0 %v213_v13  ;;  %v468_v13 = vsub.s32 0, %v236_v25  ;;  %p728_p8 = por %p727_p7, %p726_p5 }
  0x42   : > { %629 = vmatpush3.xpose.msk.msra.mxu1 %vm370_vm2, %v289_v20 }
  0x43   : > { %630 = vmatprep.subr.mxu1 %v788_v16  ;;  %p729_p10 = pnand %p728_p8, %p722_p4 }
  0x44   : > { %223 = vmax.xlane.f32.xlu1 %v222_v14 }
  0x45   : > { %220 = vmax.xlane.f32.xlu0 %v219_v15 }
  0x46   : > { %631 = vmatpush3.xpose.msk.msra.mxu1 %vm370_vm2, %v288_v58 }
  0xc1   : > { %v205_v23 = vpop.xlane.xlu1 %204 }
  0xc2   : > { %v199_v26 = vpop.xlane.xlu0 %198  ;;  %v227_v36 = vmul.f32 0.00390625, %v205_v23 }
  0xc3   : > { %v225_v31 = vmul.f32 0.00390625, %v199_v26 }
  0xc4   : > { %v250_v46 = vrot.slane %v227_v36, %v249_v35 }
  0xc5   : > { %v208_v28 = vpop.xlane.xlu1 %207  ;;  %v238_v39 = vrot.slane %v225_v31, %v237_v30 }
  0xc6   : > { %v202_v33 = vpop.xlane.xlu0 %201  ;;  %v228_v41 = vmul.f32 0.00390625, %v208_v28 }
  0xc7   : > { %v226_v34 = vmul.f32 0.00390625, %v202_v33 }
  0xc8   : > { %v257_v48 = vrot.slane %v228_v41, %v256_v40 }
  0xc9   : > { %v243_v37 = vrot.slane %v226_v34, %v242_v29  ;;  %v218_v38 = vpop.xlane.xlu1 %217 }
  0xca   : > { %v215_v42 = vpop.xlane.xlu0 %214  ;;  %v272_v44 = vrot.slane %v218_v38, %v242_v29 }
  0xcb   : > { %v245_v43 = vsel %vm244_vm3, %v243_v37, %v238_v39  ;;  %v268_v45 = vrot.slane %v215_v42, %v237_v30 }
  0xcc   : > { %v252_v52 = vsel %vm251_vm4, %v250_v46, %v245_v43 }
  0xcd   : > { %v224_v47 = vpop.xlane.xlu1 %223  ;;  %v273_v53 = vsel %vm244_vm3, %v272_v44, %v268_v45  ;;  %v259_v56 = vsel %vm258_vm5, %v257_v48, %v252_v52 }
  0xce   : > { %v221_v49 = vpop.xlane.xlu0 %220  ;;  %v282_v50 = vrot.slane %v224_v47, %v256_v40 }
  0xcf   : > { %v277_v51 = vrot.slane %v221_v49, %v249_v35 }
  0xd1   : > { %v278_v54 = vsel %vm251_vm4, %v277_v51, %v273_v53 }
  0xd2   : > { %v283_v55 = vsel %vm258_vm5, %v282_v50, %v278_v54 }
  0xd3   : > { %v286_v57 = vsel %vm285_vm6, %v259_v56, %v283_v55 }
  0xd4   : > { %622 = vmatmul.mubr.msk.f32.vlgmr.msra.gmra.mxu0 %vm292_vm0, %v286_v57 }
 0x194   : > { %v365_v59 = vpop.f32.mrf.mxu0 }
 0x195   : > { %v369_v60 = vmax.f32 %v365_v59, 0.0 }
 0x196   : > { %v623_v61 = vpop.f32.mrf.mxu0 }
 0x197   : > { %633 = vmatmul.mubr.msk.f32.vlgmr.msra.gmra.mxu1 %vm370_vm2, %v369_v60 }
 0x257   : > { %v452_v62 = vpop.f32.mrf.mxu1 }
 0x258   : > { %v457_v63 = vrot.slane %v452_v62, 1 }
 0x259   : > { %v634_v3 = vpop.f32.mrf.mxu1 }
 0x25a   : > { %v459_v7 = vadd.f32 %v457_v63, %v452_v62 }
 0x25c   : > { %v604_v10 = vmul.f32 -1.442695, %v459_v7 }
 0x25e   : > { %687 = vpow2.f32 %v604_v10 }
 0x26b   : > { %v688_v11 = vpop.eup %687 }
 0x26c   : > { %v463_v12 = vadd.f32 1.0, %v688_v11 }
 0x26e   : > { %689 = vrcp.f32 %v463_v12 }
 0x27b   : > { %v690_v14 = vpop.eup %689 }
 0x27c   : > { %v469_v15 = vrot.slane %v690_v14, %v468_v13 }
 0x27e   : > { %475 = vbcast.lane.b32.xlu1 %v469_v15, 264  ;;  %471 = vbcast.lane.b32.xlu0 %v469_v15, 256 }
 0x282   : > { %479 = vbcast.lane.b32.xlu1 %v469_v15, 272 }
 0x286   : > { %483 = vbcast.lane.b32.xlu1 %v469_v15, 280 }
 0x2f0   : > { %v476_v16 = vpop.permute.xlu1 %475  ;;  %v472_v17 = vpop.permute.xlu0 %471 }
 0x2f1   : > { %v487_v18 = vmul.f32 %v476_v16, %v936_v8  ;;  %v488_v19 = vmul.f32 %v476_v16, %v938_v9  ;;  %v485_v20 = vmul.f32 %v472_v17, %v924_v2  ;;  %v486_v21 = vmul.f32 %v472_v17, %v928_v4 }
 0x2f3   : > { %495 = vst [vmem:[%s188_s27 + $0x10] sm:$0xff] %v487_v18  ;;  %496 = vst [vmem:[%s188_s27 + $0x18] sm:$0xff] %v488_v19 }
 0x2f4   : > { %493 = vst [vmem:[%s188_s27] sm:$0xff] %v485_v20  ;;  %494 = vst [vmem:[%s188_s27 + $0x8] sm:$0xff] %v486_v21  ;;  %v480_v22 = vpop.permute.xlu1 %479 }
 0x2f5   : > { %v489_v23 = vmul.f32 %v480_v22, %v920_v0  ;;  %v490_v8 = vmul.f32 %v480_v22, %v922_v1 }
 0x2f7   : > { %497 = vst [vmem:[%s188_s27 + $0x20] sm:$0xff] %v489_v23  ;;  %498 = vst [vmem:[%s188_s27 + $0x28] sm:$0xff] %v490_v8 }
 0x2f8   : > { %v484_v2 = vpop.permute.xlu1 %483 }
 0x2f9   : > { %v491_v4 = vmul.f32 %v484_v2, %v930_v5  ;;  %v492_v0 = vmul.f32 %v484_v2, %v932_v6 }
 0x2fb   : > { %499 = vst [vmem:[%s188_s27 + $0x30] sm:$0xff] %v491_v4  ;;  %500 = vst [vmem:[%s188_s27 + $0x38] sm:$0xff] %v492_v0 }
 0x2fc   : > { %732 = shalt.err (!%p729_p10)
}
 0x2fd   : > { %s733_s7 = scalar_lea.hbm %s990_s10, 1024  ;;  %s737_s19 = scalar_lea.hbm %s1038_s3, 2048 }
 0x2fe   : > { %p734_p0 = scmp.ne.s32.totalorder %s990_s10, %s733_s7  ;;  %p738_p1 = scmp.lt.s32.totalorder %s990_s10, %s1038_s3 }
 0x2ff   : > { %p739_p3 = scmp.lt.s32.totalorder %s737_s19, %s733_s7 }
 0x300   : > { %p735_p2 = pnand %p734_p0, %p1047_p12 }
 0x301   : > { %p740_p6 = por %p739_p3, %p738_p1 }
 0x302   : > { %p736_p9 = pneg %p735_p2 }
 0x304   : > { %p741_p11 = pnand %p740_p6, %p736_p9 }
 0x306   : > { %744 = shalt.err (!%p741_p11)
}
 0x307   : > { %s791_s26 = smov 256   ;;  %s792_s27 = smov 16  }
 0x308   : > { %637 = dma.vmem_to_hbm [thread:$0]  (%p1047_p12), %s985_s28, 1024, %s990_s10, %s502_s16, %s791_s26, %s791_s26, %s792_s27  }
 0x309 PF: > { %s530_s29 = sand.u32 1, %s771_s12   ;;  %p1048_p13 = scmp.ne.s32.totalorder %s1044_s25, 0 }
 0x30a   : > { %p1049_p4 = scmp.ge.s32.totalorder %s783_s15, 2  ;;  %s531_s30 = scalar_lea.sflag [#allocation4], %s530_s29 }
 0x30c   : > { %p644_p5 = pnand %p1049_p4, %p1048_p13 }
 0x30e   : > { %p645_p7 = pneg %p644_p5 }
 0x310   : > { %766 = dma.done.wait (%p645_p7), %s531_s30, 1024  }
 0x311   : > { %768 = vsyncadd (%p645_p7), %s531_s30, 4294966272  ;;  %p16_p8 = scmp.ge.s32.totalorder %s838_s18, 4   ;;  %s1050_s12 = smov %s775_s13 }
 0x312   : > { %s1051_s13 = smov %s779_s14  ;;  %s1052_s14 = smov %s850_s21 }
 0x313   : > { %s1053_s15 = smov %s838_s18  ;;  %18 = sbr.rel (!%p16_p8) target bundleno = 5 (0x5), region = 77 }
 0x318   :  { %536 = vsyncpa [#allocation3], 1 }
 0x319   :  { %538 = vsyncpa [#allocation3 + $0x1], 1 }
 0x31a   :  { %539 = vsyncpa [#allocation4], 1 }
 0x31b   :  { %541 = vsyncpa [#allocation4 + $0x1], 1 }

</bundles_post_ra>
